<compile_context>
chip_gen: v6e
topology: v6e:2x2x1
jax: 0.10.0
libtpu: 0.0.40
codegen_flags: <defaults>
</compile_context>

<pallas_src>
import jax
import jax.numpy as jnp
from jax import lax
from jax.experimental import pallas as pl
from jax.experimental.pallas import tpu as pltpu

THRESH = 0.5
MARGIN = 0.1        # unused in forward math (kept for parity with __init__)
SCALE_POS = 2.0
SCALE_NEG = 40.0


def _round_up(x, m):
    return (x + m - 1) // m * m


def _fold_sublanes(x):
    """(TM, TN) -> (8, TN) by summing 8-row slabs (pure VPU adds)."""
    tm = x.shape[0]
    acc = x[0:8, :]
    for r in range(1, tm // 8):
        acc = acc + x[r * 8:(r + 1) * 8, :]
    return acc


def _ms_partial_kernel(img_ref, txt_ref, gtp_ref, gtm_ref, out_ref):
    # img_ref: (TM, Dp) bf16, txt_ref: (Dp, TN) bf16,
    # gtp_ref: (TM, 1) i32, gtm_ref: (1, TN) i32, out_ref: (8, 128) f32.
    img = img_ref[...]
    txt = txt_ref[...]

    # Similarity tile on the MXU, f32 accumulation.
    mat = jnp.dot(img, txt, preferred_element_type=jnp.float32)   # (TM, TN)

    # z[i, j] = (gt_pre[i] == gt_pres_map[j]); boolean masks only (no float z).
    z = gtp_ref[...] == gtm_ref[...]                               # (TM, TN) bool
    m_pos = mat > 0.0
    pos_mask = z & m_pos
    neg_mask = jnp.logical_not(z) & m_pos

    # Pos/neg masks are disjoint -> single transcendental per element.
    arg = jnp.where(z, -SCALE_POS, SCALE_NEG) * (mat - THRESH)
    e = jnp.exp(arg)

    pos_e = jnp.where(pos_mask, e, 0.0)
    neg_e = jnp.where(neg_mask, e, 0.0)
    pos_c = jnp.where(pos_mask, 1.0, 0.0)
    neg_c = jnp.where(neg_mask, 1.0, 0.0)

    # VPU sublane fold first; only a small (8, TN) cross-lane reduce remains.
    sp = jnp.sum(_fold_sublanes(pos_e))
    cp = jnp.sum(_fold_sublanes(pos_c))
    sn = jnp.sum(_fold_sublanes(neg_e))
    cn = jnp.sum(_fold_sublanes(neg_c))

    # Pack the 4 partial scalars into rows 0..3 of an (8, 128) output tile.
    row = lax.broadcasted_iota(jnp.int32, (8, 128), 0)
    tile = (jnp.where(row == 0, sp, 0.0)
            + jnp.where(row == 1, cp, 0.0)
            + jnp.where(row == 2, sn, 0.0)
            + jnp.where(row == 3, cn, 0.0))
    out_ref[...] = tile


def multi_similarity_loss1(emb_img, emb_text, gt_pre, gt_pres_map, *, tm=None, tn=None):
    """JAX/Pallas equivalent of MultiSimilarityLoss1.forward (returns scalar f32)."""
    emb_img = jnp.asarray(emb_img, jnp.float32)
    emb_text = jnp.asarray(emb_text, jnp.float32)
    N, D = emb_img.shape
    M, D2 = emb_text.shape
    assert D == D2

    # Tile sizes (multiples of 8 / 128); full D per tile.
    if tm is None:
        tm = min(256, _round_up(N, 8))
    tm = _round_up(tm, 8)
    if tn is None:
        tn = min(512, _round_up(M, 128))
    tn = _round_up(tn, 128)

    n_pad = _round_up(N, tm)
    m_pad = _round_up(M, tn)
    d_pad = _round_up(D, 128)

    # Zero padding: padded rows/cols give matrix entries == 0 -> excluded by
    # the strict ">0" masks, so no explicit validity masking is required.
    img = jnp.pad(emb_img, ((0, n_pad - N), (0, d_pad - D))).astype(jnp.bfloat16)
    txt_t = jnp.pad(emb_text, ((0, m_pad - M), (0, d_pad - D))).astype(jnp.bfloat16).T  # (Dp, Mp)

    gt_pre2 = jnp.pad(jnp.asarray(gt_pre, jnp.int32), (0, n_pad - N),
                      constant_values=-1).reshape(n_pad, 1)
    gt_map2 = jnp.pad(jnp.asarray(gt_pres_map, jnp.int32), (0, m_pad - M),
                      constant_values=-2).reshape(1, m_pad)

    grid_n = n_pad // tm
    grid_m = m_pad // tn

    partials = pl.pallas_call(
        _ms_partial_kernel,
        out_shape=jax.ShapeDtypeStruct((grid_n, grid_m, 8, 128), jnp.float32),
        grid=(grid_n, grid_m),
        in_specs=[
            # img tile re-DMA'd only when i changes (j is the inner grid axis).
            pl.BlockSpec((tm, d_pad), lambda i, j: (i, 0)),
            pl.BlockSpec((d_pad, tn), lambda i, j: (0, j)),
            pl.BlockSpec((tm, 1), lambda i, j: (i, 0)),
            pl.BlockSpec((1, tn), lambda i, j: (0, j)),
        ],
        # Each grid step owns its own (8,128) partial tile -> no cross-step
        # state, so both axes can be "parallel" (megacore on v7x).
        out_specs=pl.BlockSpec((None, None, 8, 128), lambda i, j: (i, j, 0, 0)),
        compiler_params=pltpu.CompilerParams(
            dimension_semantics=("parallel", "parallel"),
            vmem_limit_bytes=48 * 1024 * 1024,
        ),
    )(img, txt_t, gt_pre2, gt_map2)

    # Tiny finalize over 4 scalars (sum of per-tile partials).
    sum_p = jnp.sum(partials[:, :, 0, 0])
    cnt_p = jnp.sum(partials[:, :, 1, 0])
    sum_n = jnp.sum(partials[:, :, 2, 0])
    cnt_n = jnp.sum(partials[:, :, 3, 0])
    # TODO(synk): counts are accumulated in f32; exact only up to 2^24 masked
    # elements per tile-partial (fine for realistic batch sizes).

    pos_loss = jnp.where(
        cnt_p > 0.0,
        (1.0 / SCALE_POS) * jnp.log1p(sum_p) / jnp.maximum(cnt_p, 1.0), 0.0)
    neg_loss = jnp.where(
        cnt_n > 0.0,
        (1.0 / SCALE_NEG) * jnp.log1p(sum_n) / jnp.maximum(cnt_n, 1.0), 0.0)
    # Empty-branch case yields 0.0, matching torch's "return zeros([])" value.
    return pos_loss + neg_loss


def _reference(emb_img, emb_text, gt_pre, gt_pres_map):
    """Pure-JAX reference (torch math; bf16 matmul to match the kernel's MXU path)."""
    mat = jnp.dot(emb_img.astype(jnp.bfloat16), emb_text.astype(jnp.bfloat16).T,
                  preferred_element_type=jnp.float32)
    z = gt_pre[:, None] == gt_pres_map[None, :]
    m_pos = mat > 0.0
    pos_mask = z & m_pos
    neg_mask = (~z) & m_pos
    cnt_p = jnp.sum(pos_mask.astype(jnp.float32))
    cnt_n = jnp.sum(neg_mask.astype(jnp.float32))
    sum_p = jnp.sum(jnp.where(pos_mask, jnp.exp(-SCALE_POS * (mat - THRESH)), 0.0))
    sum_n = jnp.sum(jnp.where(neg_mask, jnp.exp(SCALE_NEG * (mat - THRESH)), 0.0))
    pos = jnp.where(cnt_p > 0, (1.0 / SCALE_POS) * jnp.log1p(sum_p) / jnp.maximum(cnt_p, 1.0), 0.0)
    neg = jnp.where(cnt_n > 0, (1.0 / SCALE_NEG) * jnp.log1p(sum_n) / jnp.maximum(cnt_n, 1.0), 0.0)
    return pos + neg


if __name__ == "__main__":
    key = jax.random.PRNGKey(0)
    k1, k2, k3, k4 = jax.random.split(key, 4)

    N, M, D = 16, 200, 40
    emb_img = jax.random.normal(k1, (N, D), jnp.float32)
    emb_text = jax.random.normal(k2, (M, D), jnp.float32)
    # L2-normalize (typical for similarity losses; keeps exp() in range)
    emb_img = emb_img / jnp.linalg.norm(emb_img, axis=-1, keepdims=True)
    emb_text = emb_text / jnp.linalg.norm(emb_text, axis=-1, keepdims=True)

    gt_pre = jax.random.randint(k3, (N,), 0, 4, jnp.int32)
    gt_pres_map = jax.random.randint(k4, (M,), 0, 4, jnp.int32)

    ref = _reference(emb_img, emb_text, gt_pre, gt_pres_map)

    # Default (single-tile) path and an explicitly tiled 2x2-grid path.
    loss_auto = jax.block_until_ready(
        multi_similarity_loss1(emb_img, emb_text, gt_pre, gt_pres_map))
    loss_tiled = jax.block_until_ready(
        multi_similarity_loss1(emb_img, emb_text, gt_pre, gt_pres_map, tm=8, tn=128))

    assert jnp.allclose(loss_auto, ref, rtol=1e-3, atol=1e-6), (loss_auto, ref)
    assert jnp.allclose(loss_tiled, ref, rtol=1e-3, atol=1e-6), (loss_tiled, ref)

    # TODO(synk): the torch module's print() debugging statements are not replicated.
    print("KERNEL_OK")
</pallas_src>

<mosaic_0001>
module attributes {stable_mosaic.version = 11 : i64} {
  func.func @_ms_partial_kernel(%arg0: i32, %arg1: i32, %arg2: memref<16x128xbf16, #tpu.memory_space<vmem>>, %arg3: memref<128x256xbf16, #tpu.memory_space<vmem>>, %arg4: memref<16x1xi32, #tpu.memory_space<vmem>>, %arg5: memref<1x256xi32, #tpu.memory_space<vmem>>, %arg6: memref<1x1x8x128xf32, #tpu.memory_space<vmem>>) attributes {dimension_semantics = [#tpu.dimension_semantics<parallel>, #tpu.dimension_semantics<parallel>], iteration_bounds = array<i64: 1, 1>, scalar_prefetch = 0 : i64, scratch_operands = 0 : i64, tpu.core_type = #tpu.core_type<tc>, window_params = [{transform_indices = @transform_0, window_bounds = array<i64: 16, 128>}, {transform_indices = @transform_1, window_bounds = array<i64: 128, 256>}, {transform_indices = @transform_2, window_bounds = array<i64: 16, 1>}, {transform_indices = @transform_3, window_bounds = array<i64: 1, 256>}, {transform_indices = @transform_4, window_bounds = array<i64: 1, 1, 8, 128>}]} {
    %c0 = arith.constant 0 : index
    %c0_0 = arith.constant 0 : index
    %0 = vector.load %arg2[%c0, %c0_0] : memref<16x128xbf16, #tpu.memory_space<vmem>>, vector<16x128xbf16>
    %c0_1 = arith.constant 0 : index
    %c0_2 = arith.constant 0 : index
    %1 = vector.load %arg3[%c0_1, %c0_2] : memref<128x256xbf16, #tpu.memory_space<vmem>>, vector<128x256xbf16>
    %cst = arith.constant dense<0.000000e+00> : vector<16x256xf32>
    %2 = tpu.matmul %0, %1, %cst {dimension_numbers = #tpu.dot_dimension_numbers<[1], [0], [0], [1], [0, 0, 1, 1], [], []>} : vector<16x128xbf16>, vector<128x256xbf16>, vector<16x256xf32> -> vector<16x256xf32>
    %c0_3 = arith.constant 0 : index
    %c0_4 = arith.constant 0 : index
    %3 = vector.load %arg4[%c0_3, %c0_4] : memref<16x1xi32, #tpu.memory_space<vmem>>, vector<16x1xi32>
    %c0_5 = arith.constant 0 : index
    %c0_6 = arith.constant 0 : index
    %4 = vector.load %arg5[%c0_5, %c0_6] : memref<1x256xi32, #tpu.memory_space<vmem>>, vector<1x256xi32>
    %5 = vector.broadcast %3 : vector<16x1xi32> to vector<16x256xi32>
    %6 = vector.broadcast %4 : vector<1x256xi32> to vector<16x256xi32>
    %7 = arith.cmpi eq, %5, %6 : vector<16x256xi32>
    %cst_7 = arith.constant 0.000000e+00 : f32
    %8 = vector.broadcast %cst_7 : f32 to vector<16x256xf32>
    %9 = arith.cmpf ogt, %2, %8 : vector<16x256xf32>
    %10 = arith.andi %7, %9 : vector<16x256xi1>
    %cst_8 = arith.constant dense<true> : vector<16x256xi1>
    %11 = arith.xori %7, %cst_8 : vector<16x256xi1>
    %12 = arith.andi %11, %9 : vector<16x256xi1>
    %cst_9 = arith.constant -2.000000e+00 : f32
    %cst_10 = arith.constant 4.000000e+01 : f32
    %13 = vector.broadcast %cst_9 : f32 to vector<16x256xf32>
    %14 = vector.broadcast %cst_10 : f32 to vector<16x256xf32>
    %15 = arith.select %7, %13, %14 : vector<16x256xi1>, vector<16x256xf32>
    %cst_11 = arith.constant 5.000000e-01 : f32
    %16 = vector.broadcast %cst_11 : f32 to vector<16x256xf32>
    %17 = arith.subf %2, %16 : vector<16x256xf32>
    %18 = arith.mulf %15, %17 : vector<16x256xf32>
    %19 = math.exp %18 : vector<16x256xf32>
    %cst_12 = arith.constant 0.000000e+00 : f32
    %20 = vector.broadcast %cst_12 : f32 to vector<16x256xf32>
    %21 = arith.select %10, %19, %20 : vector<16x256xi1>, vector<16x256xf32>
    %cst_13 = arith.constant 0.000000e+00 : f32
    %22 = vector.broadcast %cst_13 : f32 to vector<16x256xf32>
    %23 = arith.select %12, %19, %22 : vector<16x256xi1>, vector<16x256xf32>
    %cst_14 = arith.constant 1.000000e+00 : f32
    %cst_15 = arith.constant 0.000000e+00 : f32
    %24 = vector.broadcast %cst_14 : f32 to vector<16x256xf32>
    %25 = vector.broadcast %cst_15 : f32 to vector<16x256xf32>
    %26 = arith.select %10, %24, %25 : vector<16x256xi1>, vector<16x256xf32>
    %cst_16 = arith.constant 1.000000e+00 : f32
    %cst_17 = arith.constant 0.000000e+00 : f32
    %27 = vector.broadcast %cst_16 : f32 to vector<16x256xf32>
    %28 = vector.broadcast %cst_17 : f32 to vector<16x256xf32>
    %29 = arith.select %12, %27, %28 : vector<16x256xi1>, vector<16x256xf32>
    %30 = vector.extract_strided_slice %21 {offsets = [0, 0], sizes = [8, 256], strides = [1, 1]} : vector<16x256xf32> to vector<8x256xf32>
    %31 = vector.extract_strided_slice %21 {offsets = [8, 0], sizes = [8, 256], strides = [1, 1]} : vector<16x256xf32> to vector<8x256xf32>
    %32 = arith.addf %30, %31 : vector<8x256xf32>
    %33 = vector.shape_cast %32 : vector<8x256xf32> to vector<1x8x256xf32>
    %cst_18 = arith.constant dense<0.000000e+00> : vector<1xf32>
    %34 = vector.multi_reduction <add>, %33, %cst_18 [1, 2] : vector<1x8x256xf32> to vector<1xf32>
    %35 = vector.shape_cast %34 : vector<1xf32> to vector<1x1x1xf32>
    %36 = vector.extract %35[0, 0, 0] : f32 from vector<1x1x1xf32>
    %37 = vector.extract_strided_slice %26 {offsets = [0, 0], sizes = [8, 256], strides = [1, 1]} : vector<16x256xf32> to vector<8x256xf32>
    %38 = vector.extract_strided_slice %26 {offsets = [8, 0], sizes = [8, 256], strides = [1, 1]} : vector<16x256xf32> to vector<8x256xf32>
    %39 = arith.addf %37, %38 : vector<8x256xf32>
    %40 = vector.shape_cast %39 : vector<8x256xf32> to vector<1x8x256xf32>
    %cst_19 = arith.constant dense<0.000000e+00> : vector<1xf32>
    %41 = vector.multi_reduction <add>, %40, %cst_19 [1, 2] : vector<1x8x256xf32> to vector<1xf32>
    %42 = vector.shape_cast %41 : vector<1xf32> to vector<1x1x1xf32>
    %43 = vector.extract %42[0, 0, 0] : f32 from vector<1x1x1xf32>
    %44 = vector.extract_strided_slice %23 {offsets = [0, 0], sizes = [8, 256], strides = [1, 1]} : vector<16x256xf32> to vector<8x256xf32>
    %45 = vector.extract_strided_slice %23 {offsets = [8, 0], sizes = [8, 256], strides = [1, 1]} : vector<16x256xf32> to vector<8x256xf32>
    %46 = arith.addf %44, %45 : vector<8x256xf32>
    %47 = vector.shape_cast %46 : vector<8x256xf32> to vector<1x8x256xf32>
    %cst_20 = arith.constant dense<0.000000e+00> : vector<1xf32>
    %48 = vector.multi_reduction <add>, %47, %cst_20 [1, 2] : vector<1x8x256xf32> to vector<1xf32>
    %49 = vector.shape_cast %48 : vector<1xf32> to vector<1x1x1xf32>
    %50 = vector.extract %49[0, 0, 0] : f32 from vector<1x1x1xf32>
    %51 = vector.extract_strided_slice %29 {offsets = [0, 0], sizes = [8, 256], strides = [1, 1]} : vector<16x256xf32> to vector<8x256xf32>
    %52 = vector.extract_strided_slice %29 {offsets = [8, 0], sizes = [8, 256], strides = [1, 1]} : vector<16x256xf32> to vector<8x256xf32>
    %53 = arith.addf %51, %52 : vector<8x256xf32>
    %54 = vector.shape_cast %53 : vector<8x256xf32> to vector<1x8x256xf32>
    %cst_21 = arith.constant dense<0.000000e+00> : vector<1xf32>
    %55 = vector.multi_reduction <add>, %54, %cst_21 [1, 2] : vector<1x8x256xf32> to vector<1xf32>
    %56 = vector.shape_cast %55 : vector<1xf32> to vector<1x1x1xf32>
    %57 = vector.extract %56[0, 0, 0] : f32 from vector<1x1x1xf32>
    %58 = tpu.iota {dimensions = array<i32: 0>} : vector<8x128xi32>
    %c0_i32 = arith.constant 0 : i32
    %59 = vector.broadcast %c0_i32 : i32 to vector<8x128xi32>
    %60 = arith.cmpi eq, %58, %59 : vector<8x128xi32>
    %cst_22 = arith.constant 0.000000e+00 : f32
    %61 = vector.broadcast %36 : f32 to vector<8x128xf32>
    %62 = vector.broadcast %cst_22 : f32 to vector<8x128xf32>
    %63 = arith.select %60, %61, %62 : vector<8x128xi1>, vector<8x128xf32>
    %c1_i32 = arith.constant 1 : i32
    %64 = vector.broadcast %c1_i32 : i32 to vector<8x128xi32>
    %65 = arith.cmpi eq, %58, %64 : vector<8x128xi32>
    %cst_23 = arith.constant 0.000000e+00 : f32
    %66 = vector.broadcast %43 : f32 to vector<8x128xf32>
    %67 = vector.broadcast %cst_23 : f32 to vector<8x128xf32>
    %68 = arith.select %65, %66, %67 : vector<8x128xi1>, vector<8x128xf32>
    %69 = arith.addf %63, %68 : vector<8x128xf32>
    %c2_i32 = arith.constant 2 : i32
    %70 = vector.broadcast %c2_i32 : i32 to vector<8x128xi32>
    %71 = arith.cmpi eq, %58, %70 : vector<8x128xi32>
    %cst_24 = arith.constant 0.000000e+00 : f32
    %72 = vector.broadcast %50 : f32 to vector<8x128xf32>
    %73 = vector.broadcast %cst_24 : f32 to vector<8x128xf32>
    %74 = arith.select %71, %72, %73 : vector<8x128xi1>, vector<8x128xf32>
    %75 = arith.addf %69, %74 : vector<8x128xf32>
    %c3_i32 = arith.constant 3 : i32
    %76 = vector.broadcast %c3_i32 : i32 to vector<8x128xi32>
    %77 = arith.cmpi eq, %58, %76 : vector<8x128xi32>
    %cst_25 = arith.constant 0.000000e+00 : f32
    %78 = vector.broadcast %57 : f32 to vector<8x128xf32>
    %79 = vector.broadcast %cst_25 : f32 to vector<8x128xf32>
    %80 = arith.select %77, %78, %79 : vector<8x128xi1>, vector<8x128xf32>
    %81 = arith.addf %75, %80 : vector<8x128xf32>
    %c0_26 = arith.constant 0 : index
    %c0_27 = arith.constant 0 : index
    %c0_28 = arith.constant 0 : index
    %c0_29 = arith.constant 0 : index
    %82 = vector.load %arg6[%c0_26, %c0_27, %c0_28, %c0_29] : memref<1x1x8x128xf32, #tpu.memory_space<vmem>>, vector<1x1x8x128xf32>
    %83 = vector.shape_cast %82 : vector<1x1x8x128xf32> to vector<8x128xf32>
    %84 = vector.shape_cast %81 : vector<8x128xf32> to vector<1x1x8x128xf32>
    tpu.vector_store %arg6[%c0_26, %c0_27, %c0_28, %c0_29], %84 {strides = array<i32>} : memref<1x1x8x128xf32, #tpu.memory_space<vmem>>, vector<1x1x8x128xf32>,
    return
  }
  func.func @transform_0(%arg0: i32, %arg1: i32) -> (i32, i32) {
    %c0_i32 = arith.constant 0 : i32
    %c0_i32_0 = arith.constant 0 : i32
    return %arg0, %c0_i32 : i32, i32
  }
  func.func @transform_1(%arg0: i32, %arg1: i32) -> (i32, i32) {
    %c0_i32 = arith.constant 0 : i32
    %c0_i32_0 = arith.constant 0 : i32
    return %c0_i32, %arg1 : i32, i32
  }
  func.func @transform_2(%arg0: i32, %arg1: i32) -> (i32, i32) {
    %c0_i32 = arith.constant 0 : i32
    %c0_i32_0 = arith.constant 0 : i32
    return %arg0, %c0_i32 : i32, i32
  }
  func.func @transform_3(%arg0: i32, %arg1: i32) -> (i32, i32) {
    %c0_i32 = arith.constant 0 : i32
    %c0_i32_0 = arith.constant 0 : i32
    return %c0_i32, %arg1 : i32, i32
  }
  func.func @transform_4(%arg0: i32, %arg1: i32) -> (i32, i32, i32, i32) {
    %c0_i32 = arith.constant 0 : i32
    %c0_i32_0 = arith.constant 0 : i32
    %c0_i32_1 = arith.constant 0 : i32
    return %arg0, %arg1, %c0_i32, %c0_i32_0 : i32, i32, i32, i32
  }
}

</mosaic_0001>

<bundles_post_ra>
// kernel: tpu_custom_call.1
= control target key start
LH: loop header
LB: loop body
LE: loop exit
PB: predicated region body
PF: predicated region fallthrough
CT: control target
= control target key end

     0   :  { %9 = vsyncpa [#allocation3], 0  ;;  %s584_s0 = inlined_call_operand.vmem [shape: bf16[16,128], index: 0, kind: input, shape index: {}]   ;;  %s585_s1 = inlined_call_operand.hbm [shape: bf16[128,256], index: 1, kind: input, shape index: {}]   ;;  %s586_s2 = inlined_call_operand.vmem [shape: s32[16,1], index: 2, kind: input, shape index: {}]   ;;  %s587_s3 = inlined_call_operand.vmem [shape: s32[1,256], index: 3, kind: input, shape index: {}]   ;;  %s588_s4 = inlined_call_operand.hbm [shape: f32[1,1,8,128], index: 4, kind: output, shape index: {}]  }
   0x1   :  { %10 = vsyncpa [#allocation4], 0  ;;  %s449_s15 = smov [#allocation2]  }
   0x2   :  { %s18_s16 = sshll.u32 %s449_s15, 4  ;;  %s19_s16 = int_to_ptr.vmem [resolvable:$true] %s18_s16 }
   0x3   :  { %s413_s17 = scalar_lea.vmem %s19_s16, 2048  ;;  %p418_p1 = scmp.lt.s32.totalorder %s19_s16, %s19_s16 }
   0x4   :  { %p414_p0 = scmp.ne.s32.totalorder %s19_s16, %s413_s17  ;;  %p419_p2 = scmp.lt.s32.totalorder %s413_s17, %s413_s17 }
   0x6   :  { %p420_p3 = por %p419_p2, %p418_p1 }
   0x8   :  { %p421_p4 = pnand %p420_p3, %p414_p0 }
   0xa   :  { %424 = shalt.err (!%p421_p4)
}
   0xb   :  { %s450_s18 = smov 128   ;;  %s451_s19 = smov 8  }
   0xc   :  { %24 = dma.hbm_to_vmem [thread:$0]  %s585_s1, 2048, %s19_s16, [#allocation3], %s450_s18, %s450_s18, %s451_s19  }
   0xd   :  { %445 = dma.done.wait [#allocation3], 2048  }
   0xe   :  { %446 = vsyncadd [#allocation3], 4294965248  ;;  %v452_v0 = vmov 0   ;;  %v372_v1 = vld [vmem:[#allocation2 + $0x74] ss:$8 sps:$4 sm:$0xff]   ;;  %v180_v9 = vld [vmem:[%s586_s2] sm:$0xff]  ;;  %v189_v20 = vlaneseq }
   0xf   :  { %169 = vmatprep.mubr.bf16.mxu0 %v452_v0  ;;  %371 = vset.pattern.permute.xlu0 %v452_v0  ;;  %v374_v2 = vld [vmem:[#allocation2 + $0x70] ss:$8 sps:$4 sm:$0xff]   ;;  %v375_v3 = vld [vmem:[#allocation2 + $0x64] ss:$8 sps:$4 sm:$0xff]   ;;  %v377_v4 = vld [vmem:[#allocation2 + $0x60] ss:$8 sps:$4 sm:$0xff]  }
  0x10   :  { %137 = vmatprep.subr.bf16.mxu0 %v372_v1  ;;  %v378_v5 = vld [vmem:[#allocation2 + $0x54] ss:$8 sps:$4 sm:$0xff]   ;;  %v380_v6 = vld [vmem:[#allocation2 + $0x50] ss:$8 sps:$4 sm:$0xff]   ;;  %v381_v7 = vld [vmem:[#allocation2 + $0x44] ss:$8 sps:$4 sm:$0xff]   ;;  %184 = vperm.xlu0 %371, %v180_v9  }
  0x11   :  { %138 = vmatpush1.bf16.msra.mxu0 %v374_v2  ;;  %v383_v8 = vld [vmem:[#allocation2 + $0x40] ss:$8 sps:$4 sm:$0xff]   ;;  %v384_v10 = vld [vmem:[#allocation2 + $0x34] ss:$8 sps:$4 sm:$0xff]   ;;  %v386_v12 = vld [vmem:[#allocation2 + $0x30] ss:$8 sps:$4 sm:$0xff]  }
  0x12   :  { %139 = vmatprep.subr.bf16.mxu0 %v375_v3  ;;  %v181_v11 = vld [vmem:[%s586_s2 + $0x8] sm:$0xff]  ;;  %v390_v15 = vld [vmem:[#allocation2 + $0x14] ss:$8 sps:$4 sm:$0xff]   ;;  %v392_v16 = vld [vmem:[#allocation2 + $0x10] ss:$8 sps:$4 sm:$0xff]   ;;  %v494_v21 = vshrl.u32 %v189_v20, 7 }
  0x13   :  { %v387_v13 = vld [vmem:[#allocation2 + $0x24] ss:$8 sps:$4 sm:$0xff]   ;;  %v389_v14 = vld [vmem:[#allocation2 + $0x20] ss:$8 sps:$4 sm:$0xff]   ;;  %v453_v28 = vmov 40.0   ;;  %v595_v39 = vmov 0 }
  0x14   :  { %187 = vperm.xlu0 %371, %v181_v11   ;;  %v393_v17 = vld [vmem:[#allocation2 + $0x4] ss:$8 sps:$4 sm:$0xff]   ;;  %v395_v18 = vld [vmem:[#allocation2] ss:$8 sps:$4 sm:$0xff]   ;;  %v191_v22 = vsub.s32 0, %v494_v21  ;;  %v195_v24 = vsub.s32 1, %v494_v21 }
  0x15   :  { %140 = vmatpush1.bf16.msra.mxu0 %v377_v4  ;;  %v396_v19 = vld [vmem:[%s584_s0] sm:$0xff]   ;;  %v599_v48 = vmov 0  ;;  %v454_v51 = vmov 0.0   ;;  %vm455_vm12 = vmmov 1   ;;  %s456_s30 = smov [#allocation5]  }
  0x16   :  { %141 = vmatprep.subr.bf16.mxu0 %v378_v5  ;;  %v182_v23 = vld [vmem:[%s587_s3] sm:$0x3]  ;;  %s325_s5 = sshll.u32 %s456_s30, 4  ;;  %s326_s5 = int_to_ptr.vmem [resolvable:$true] %s325_s5 }
  0x17   :  { %v192_v25 = vrot.slane %v182_v23, %v191_v22  ;;  %v196_v27 = vrot.slane %v182_v23, %v195_v24  ;;  %s425_s6 = scalar_lea.vmem %s326_s5, 128  ;;  %p430_p6 = scmp.lt.s32.totalorder %s326_s5, %s326_s5 }
  0x18   :  { %p426_p5 = scmp.ne.s32.totalorder %s326_s5, %s425_s6  ;;  %p431_p7 = scmp.lt.s32.totalorder %s425_s6, %s425_s6 }
  0x19   :  { %142 = vmatpush1.bf16.msra.mxu0 %v380_v6 }
  0x1a   :  { %143 = vmatprep.subr.bf16.mxu0 %v381_v7  ;;  %p432_p8 = por %p431_p7, %p430_p6 }
  0x1c   :  { %p433_p9 = pnand %p432_p8, %p426_p5 }
  0x1d   :  { %144 = vmatpush1.bf16.msra.mxu0 %v383_v8 }
  0x1e   :  { %145 = vmatprep.subr.bf16.mxu0 %v384_v10 }
  0x21   :  { %146 = vmatpush1.bf16.msra.mxu0 %v386_v12 }
  0x22   :  { %147 = vmatprep.subr.bf16.mxu0 %v387_v13 }
  0x25   :  { %148 = vmatpush1.bf16.msra.mxu0 %v389_v14 }
  0x26   :  { %149 = vmatprep.subr.bf16.mxu0 %v390_v15 }
  0x29   :  { %150 = vmatpush1.bf16.msra.mxu0 %v392_v16 }
  0x2a   :  { %151 = vmatprep.subr.bf16.mxu0 %v393_v17 }
  0x2d   :  { %152 = vmatpush1.bf16.msra.mxu0 %v395_v18 }
  0x30   :  { %170 = vmatmul.mubr.bf16.vlgmr.msra.gmra.mxu0 %v396_v19 }
  0x8b   :  { %v185_v26 = vpop.permute.xlu0 %184 }
  0x8c   :  { %vm197_vm0 = vcmp.eq.s32.totalorder %v185_v26, %v192_v25  ;;  %vm198_vm1 = vcmp.eq.s32.totalorder %v185_v26, %v196_v27 }
  0x8d   :  { %v217_v29 = vsel %vm197_vm0, -2.0, %v453_v28  ;;  %v218_v33 = vsel %vm198_vm1, -2.0, %v453_v28  ;;  %vm209_vm13 = vmxor %vm197_vm0, %vm455_vm12 }
  0x8e   :  { %vm210_vm14 = vmxor %vm198_vm1, %vm455_vm12 }
  0x8f   :  { %v188_v31 = vpop.permute.xlu0 %187 }
  0x90   :  { %vm199_vm3 = vcmp.eq.s32.totalorder %v188_v31, %v192_v25  ;;  %vm200_vm6 = vcmp.eq.s32.totalorder %v188_v31, %v196_v27 }
  0x91   :  { %v219_v43 = vsel %vm199_vm3, -2.0, %v453_v28  ;;  %v220_v49 = vsel %vm200_vm6, -2.0, %v453_v28  ;;  %vm211_vm15 = vmxor %vm199_vm3, %vm455_vm12 }
  0xf0   :  { %v171_v30 = vpop.f32.mrf.mxu0 }
  0xf1   :  { %vm590_vm2 = vcmp.gt.f32.partialorder %v171_v30, 0.0  ;;  %v351_v32 = vadd.f32 -0.5, %v171_v30 }
  0xf2   :  { %v173_v34 = vpop.f32.mrf.mxu0  ;;  %vm505_vm5 = vmand %vm197_vm0, %vm590_vm2  ;;  %vm605_vm0 = vcmp.gt.f32.partialorder %v171_v30, 0.0 }
  0xf3   :  { %v225_v35 = vmul.f32 %v351_v32, %v217_v29  ;;  %vm589_vm4 = vcmp.gt.f32.partialorder %v173_v34, 0.0  ;;  %v352_v36 = vadd.f32 -0.5, %v173_v34  ;;  %v245_v55 = vsel %vm505_vm5, 1.0, %v454_v51 }
  0xf4   :  { %v175_v38 = vpop.f32.mrf.mxu0  ;;  %vm511_vm7 = vmand %vm198_vm1, %vm589_vm4  ;;  %vm608_vm1 = vcmp.gt.f32.partialorder %v173_v34, 0.0 }
  0xf5   :  { %v596_v39 = vsel %vm511_vm7, 4294967295, %v595_v39  ;;  %v226_v40 = vmul.f32 %v352_v36, %v218_v33  ;;  %vm203_vm8 = vcmp.gt.f32.partialorder %v175_v38, 0.0  ;;  %v353_v41 = vadd.f32 -0.5, %v175_v38  ;;  %vm212_vm4 = vmxor %vm200_vm6, %vm455_vm12 }
  0xf6   :  { %v229_v42 = vmul.f32 1.442695, %v225_v35  ;;  %vm518_vm9 = vmand %vm199_vm3, %vm203_vm8  ;;  %v177_v45 = vpop.f32.mrf.mxu0  ;;  %v246_v56 = vsel %vm511_vm7, 1.0, %v454_v51 }
  0xf7   :  { %v227_v46 = vmul.f32 %v353_v41, %v219_v43  ;;  %vm204_vm10 = vcmp.gt.f32.partialorder %v177_v45, 0.0  ;;  %v231_v47 = vmul.f32 1.442695, %v226_v40  ;;  %v354_v50 = vadd.f32 -0.5, %v177_v45  ;;  %vm552_vm7 = vmand %vm209_vm13, %vm605_vm0 }
  0xf8   :  { %vm524_vm11 = vmand %vm200_vm6, %vm204_vm10  ;;  %v247_v52 = vsel %vm518_vm9, 1.0, %v454_v51  ;;  %397 = vpow2.f32 %v229_v42  ;;  %v249_v24 = vsel %vm552_vm7, 1.0, %v454_v51 }
  0xf9   :  { %v600_v48 = vsel %vm524_vm11, 4294967295, %v599_v48  ;;  %v233_v53 = vmul.f32 1.442695, %v227_v46  ;;  %v248_v54 = vsel %vm524_vm11, 1.0, %v454_v51  ;;  %v228_v57 = vmul.f32 %v354_v50, %v220_v49  ;;  %vm542_vm2 = vmand %vm212_vm4, %vm204_vm10 }
  0xfa   :  { %v265_v58 = vadd.f32 %v247_v52, %v245_v55  ;;  %v266_v59 = vadd.f32 %v248_v54, %v246_v56  ;;  %vm547_vm11 = vmand %vm211_vm15, %vm203_vm8  ;;  %v252_v9 = vsel %vm542_vm2, 1.0, %v454_v51  ;;  %vm609_vm4 = vnez %v596_v39 }
  0xfb   :  { %399 = vpow2.f32 %v233_v53  ;;  %v235_v60 = vmul.f32 1.442695, %v228_v57  ;;  %vm214_vm3 = vmand %vm210_vm14, %vm608_vm1  ;;  %vm610_vm6 = vnez %v600_v48  ;;  %v251_v19 = vsel %vm547_vm11, 1.0, %v454_v51 }
  0xfc   :  { %401 = vpow2.f32 %v231_v47  ;;  %v267_v61 = vadd.f32 %v266_v59, %v265_v58  ;;  %v250_v18 = vsel %vm214_vm3, 1.0, %v454_v51  ;;  %v289_v25 = vadd.f32 %v251_v19, %v249_v24 }
  0xfd   :  { %403 = vpow2.f32 %v235_v60  ;;  %v290_v23 = vadd.f32 %v252_v9, %v250_v18  ;;  %vm314_vm8 = vcmp.eq.s32.totalorder %v494_v21, 3 }
  0xfe   :  { %268 = vadd.xlane.f32.xlu1 %v267_v61 }
  0xff   :  { %v291_v26 = vadd.f32 %v290_v23, %v289_v25 }
 0x105   :  { %v398_v62 = vpop.eup %397 }
 0x106   :  { %v237_v7 = vsel %vm505_vm5, %v398_v62, 0.0  ;;  %v241_v8 = vsel %vm552_vm7, %v398_v62, 0.0  ;;  %vm306_vm5 = vcmp.eq.s32.totalorder %v494_v21, 1  ;;  %vm310_vm7 = vcmp.eq.s32.totalorder %v494_v21, 2 }
 0x108   :  { %v400_v63 = vpop.eup %399 }
 0x109   :  { %v402_v1 = vpop.eup %401  ;;  %v239_v4 = vsel %vm518_vm9, %v400_v63, 0.0  ;;  %v243_v5 = vsel %vm547_vm11, %v400_v63, 0.0 }
 0x10a   :  { %v404_v6 = vpop.eup %403  ;;  %v238_v10 = vsel %vm609_vm4, %v402_v1, 0.0  ;;  %v242_v11 = vsel %vm214_vm3, %v402_v1, 0.0  ;;  %v277_v14 = vadd.f32 %v243_v5, %v241_v8  ;;  %v253_v16 = vadd.f32 %v239_v4, %v237_v7 }
 0x10b   :  { %v240_v12 = vsel %vm610_vm6, %v404_v6, 0.0  ;;  %v244_v13 = vsel %vm542_vm2, %v404_v6, 0.0  ;;  %vm303_vm2 = vcmp.eq.s32.totalorder %v494_v21, 0 }
 0x10c   :  { %v278_v15 = vadd.f32 %v244_v13, %v242_v11  ;;  %v254_v17 = vadd.f32 %v240_v12, %v238_v10 }
 0x10e   :  { %v279_v20 = vadd.f32 %v278_v15, %v277_v14  ;;  %v255_v22 = vadd.f32 %v254_v17, %v253_v16 }
 0x110   :  { %280 = vadd.xlane.f32.xlu0 %v279_v20  ;;  %256 = vadd.xlane.f32.xlu1 %v255_v22 }
 0x114   :  { %292 = vadd.xlane.f32.xlu1 %v291_v26 }
 0x187   :  { %v269_v27 = vpop.xlane.xlu1 %268 }
 0x188   :  { %v270_v28 = vrot.slane %v269_v27, 4 }
 0x18a   :  { %v271_v29 = vadd.f32 %v270_v28, %v269_v27 }
 0x18c   :  { %v272_v30 = vrot.slane %v271_v29, 2 }
 0x18e   :  { %v273_v38 = vadd.f32 %v272_v30, %v271_v29 }
 0x190   :  { %v274_v45 = vrot.slane %v273_v38, 1 }
 0x192   :  { %v275_v52 = vadd.f32 %v274_v45, %v273_v38 }
 0x199   :  { %v281_v31 = vpop.xlane.xlu0 %280  ;;  %v257_v32 = vpop.xlane.xlu1 %256 }
 0x19a   :  { %v282_v33 = vrot.slane %v281_v31, 4  ;;  %v258_v34 = vrot.slane %v257_v32, 4 }
 0x19c   :  { %v283_v35 = vadd.f32 %v282_v33, %v281_v31  ;;  %v259_v36 = vadd.f32 %v258_v34, %v257_v32 }
 0x19d   :  { %v293_v37 = vpop.xlane.xlu1 %292 }
 0x19e   :  { %v284_v39 = vrot.slane %v283_v35, 2  ;;  %v260_v40 = vrot.slane %v259_v36, 2  ;;  %v294_v41 = vrot.slane %v293_v37, 4 }
 0x1a0   :  { %v285_v42 = vadd.f32 %v284_v39, %v283_v35  ;;  %v295_v43 = vadd.f32 %v294_v41, %v293_v37  ;;  %v261_v44 = vadd.f32 %v260_v40, %v259_v36 }
 0x1a2   :  { %v296_v46 = vrot.slane %v295_v43, 2  ;;  %v262_v47 = vrot.slane %v261_v44, 1  ;;  %v286_v48 = vrot.slane %v285_v42, 1 }
 0x1a4   :  { %v297_v49 = vadd.f32 %v296_v46, %v295_v43  ;;  %v263_v50 = vadd.f32 %v262_v47, %v261_v44  ;;  %v287_v51 = vadd.f32 %v286_v48, %v285_v42 }
 0x1a6   :  { %355 = vpush %v263_v50  ;;  %v298_v53 = vrot.slane %v297_v49, 1 }
 0x1a7   :  { %357 = vpush %v275_v52 }
 0x1a8   :  { %359 = vpush %v287_v51  ;;  %v299_v54 = vadd.f32 %v298_v53, %v297_v49 }
 0x1aa   :  { %361 = vpush %v299_v54 }
 0x1d7   :  { %s356_s0 = spop %355 }
 0x1d8   :  { %v304_v55 = vstv %s356_s0  ;;  %s358_s3 = spop %357 }
 0x1d9   :  { %v305_v56 = vsel %vm303_vm2, %v304_v55, 0.0  ;;  %v307_v57 = vstv %s358_s3  ;;  %s360_s28 = spop %359 }
 0x1da   :  { %v308_v58 = vsel %vm306_vm5, %v307_v57, 0.0  ;;  %v311_v59 = vstv %s360_s28 }
 0x1db   :  { %v309_v60 = vadd.f32 %v308_v58, %v305_v56  ;;  %s362_s29 = spop %361  ;;  %v312_v61 = vsel %vm310_vm7, %v311_v59, 0.0 }
 0x1dc   :  { %v315_v62 = vstv %s362_s29 }
 0x1dd   :  { %v313_v63 = vadd.f32 %v312_v61, %v309_v60  ;;  %v316_v0 = vsel %vm314_vm8, %v315_v62, 0.0 }
 0x1df   :  { %v317_v1 = vadd.f32 %v316_v0, %v313_v63 }
 0x1e1   :  { %318 = vst [vmem:[#allocation5] sm:$0xff] %v317_v1 }
 0x1e2   :  { %436 = shalt.err (!%p433_p9)
}
 0x1e3   :  { %328 = dma.vmem_to_hbm [thread:$0]  %s326_s5, 128, %s588_s4, [#allocation4]  }
 0x1e4   :  { %447 = dma.done.wait [#allocation4], 128  }
 0x1e5   :  { %448 = vsyncadd [#allocation4], 4294967168 }
 0x1e6   :  { %332 = vsyncpa [#allocation3], 1 }
 0x1e7   :  { %333 = vsyncpa [#allocation4], 1 }

</bundles_post_ra>
